<compile_context>
chip_gen: v5e
topology: v5e:2x2
jax: 0.10.0
libtpu: 0.0.40
codegen_flags: <defaults>
</compile_context>

<pallas_src>
import jax
import jax.numpy as jnp
from jax.experimental import pallas as pl
from jax.experimental.pallas import tpu as pltpu

LANE = 128
SUB = 8


def _round_up(x, m):
    return ((x + m - 1) // m) * m


def mlp_kernel(x_ref, w1_ref, b1_ref, w2_ref, b2_ref, o_ref):
    # fc1 (bf16 MXU, f32 acc) + bias + ReLU + fc2 (bf16 MXU, f32 acc) + bias.
    x = x_ref[...].astype(jnp.bfloat16)                              # [TB, 784] cast on VPU
    h = jnp.dot(x, w1_ref[...], preferred_element_type=jnp.float32)  # [TB, 128] f32
    h = jnp.maximum(h + b1_ref[...], 0.0)                            # bias + ReLU
    h = h.astype(jnp.bfloat16)                                       # bf16 for MXU
    out = jnp.dot(h, w2_ref[...], preferred_element_type=jnp.float32)  # [TB, Np] f32
    o_ref[...] = (out + b2_ref[...]).astype(o_ref.dtype)             # lane-dense bf16 store


def prepare_params(w1, b1, w2, b2):
    """One-time parameter prep (hoisted out of the per-call path).

    w1: [784, 128], b1: [128], w2: [128, 10], b2: [10]  (x @ W layout, i.e.
    transpose of PyTorch's [out, in] storage).
    """
    in_dim, hidden = w1.shape
    num_classes = w2.shape[1]
    n_pad = _round_up(num_classes, LANE)                # 10 -> 128 (lane-dense out)

    w1_p = w1.astype(jnp.bfloat16)                      # [784, 128]
    b1_p = b1.reshape(1, hidden).astype(jnp.float32)    # [1, 128]
    w2_p = (jnp.zeros((hidden, n_pad), jnp.bfloat16)
            .at[:, :num_classes].set(w2.astype(jnp.bfloat16)))
    b2_p = (jnp.zeros((1, n_pad), jnp.float32)
            .at[0, :num_classes].set(b2.astype(jnp.float32)))
    return (w1_p, b1_p, w2_p, b2_p, num_classes)


def neural_network_forward(x, params):
    """x: [B, C, H, W] f32 (C*H*W == 784). Returns logits [B, num_classes] f32."""
    w1_p, b1_p, w2_p, b2_p, num_classes = params
    in_dim, hidden = w1_p.shape
    n_pad = w2_p.shape[1]

    B = x.shape[0]
    x_flat = x.reshape(B, -1)                           # nn.Flatten(start_dim=1)
    assert x_flat.shape[1] == in_dim

    # Batch tile: large enough to amortize per-step overhead; but keep >= 4
    # grid steps (>= 2 per TensorCore on v7x megacore) when the batch allows.
    TB = min(1024, _round_up(B, SUB))
    if B // TB < 4 and B >= 4 * SUB:
        TB = _round_up(pl.cdiv(B, 4), SUB)
    B_pad = _round_up(B, TB)
    grid = (B_pad // TB,)

    # Only batch-row padding (if any); no dtype cast / K padding of x here.
    x_in = x_flat
    if B_pad != B:
        x_in = jnp.zeros((B_pad, in_dim), x_flat.dtype).at[:B].set(x_flat)

    flops = 2 * B_pad * in_dim * hidden + 2 * B_pad * hidden * n_pad
    bytes_accessed = (B_pad * in_dim * x_in.dtype.itemsize   # x read (f32)
                      + w1_p.size * 2 + w2_p.size * 2        # bf16 weights
                      + b1_p.size * 4 + b2_p.size * 4        # f32 biases
                      + B_pad * n_pad * 2)                   # bf16 out write

    out_padded = pl.pallas_call(
        mlp_kernel,
        out_shape=jax.ShapeDtypeStruct((B_pad, n_pad), jnp.bfloat16),
        grid_spec=pltpu.PrefetchScalarGridSpec(
            num_scalar_prefetch=0,
            grid=grid,
            in_specs=[
                # x: full K=784 last dim (equals array dim -> block rule OK),
                # pipelined along the batch grid.
                pl.BlockSpec((TB, in_dim), lambda i: (i, 0)),
                # Weights / biases: constant index_map -> fetched once, VMEM-resident.
                pl.BlockSpec((in_dim, hidden), lambda i: (0, 0)),   # w1
                pl.BlockSpec((1, hidden), lambda i: (0, 0)),        # b1
                pl.BlockSpec((hidden, n_pad), lambda i: (0, 0)),    # w2 (lane-padded)
                pl.BlockSpec((1, n_pad), lambda i: (0, 0)),         # b2 (lane-padded)
            ],
            out_specs=pl.BlockSpec((TB, n_pad), lambda i: (i, 0)),
        ),
        compiler_params=pltpu.CompilerParams(
            dimension_semantics=("parallel",)),
        cost_estimate=pl.CostEstimate(
            flops=flops, transcendentals=0, bytes_accessed=bytes_accessed),
    )(x_in, w1_p, b1_p, w2_p, b2_p)

    # Slice off batch padding + lane padding of the class dim, upcast to f32.
    return out_padded[:B, :num_classes].astype(jnp.float32)


def init_params(key, input_size=784, hidden=128, num_classes=10):
    k1, k2, k3, k4 = jax.random.split(key, 4)
    # Mirrors nn.Linear default init; weights stored as [in, out] so the
    # kernel computes x @ W.
    bound1 = 1.0 / (input_size ** 0.5)
    bound2 = 1.0 / (hidden ** 0.5)
    w1 = jax.random.uniform(k1, (input_size, hidden), jnp.float32, -bound1, bound1)
    b1 = jax.random.uniform(k2, (hidden,), jnp.float32, -bound1, bound1)
    w2 = jax.random.uniform(k3, (hidden, num_classes), jnp.float32, -bound2, bound2)
    b2 = jax.random.uniform(k4, (num_classes,), jnp.float32, -bound2, bound2)
    return w1, b1, w2, b2


if __name__ == "__main__":
    input_size = 784
    hidden = 128
    num_classes = 10
    B = 8

    key = jax.random.PRNGKey(0)
    kx, kp = jax.random.split(key)
    # MNIST-like input: [B, 1, 28, 28] -> flatten -> 784
    x = jax.random.normal(kx, (B, 1, 28, 28), jnp.float32)
    w1, b1, w2, b2 = init_params(kp, input_size, hidden, num_classes)

    params = prepare_params(w1, b1, w2, b2)   # one-time prep (outside forward)
    out = neural_network_forward(x, params)
    out = jax.block_until_ready(out)

    # Pure-JAX reference mirroring the kernel's bf16 operand / output rounding
    # and f32 accumulation.
    x_flat = x.reshape(B, -1)
    xb = x_flat.astype(jnp.bfloat16)
    w1b = w1.astype(jnp.bfloat16)
    w2b = w2.astype(jnp.bfloat16)
    h_ref = jnp.maximum(
        jnp.dot(xb, w1b, preferred_element_type=jnp.float32) + b1, 0.0)
    ref = (jnp.dot(h_ref.astype(jnp.bfloat16), w2b,
                   preferred_element_type=jnp.float32) + b2)
    ref = ref.astype(jnp.bfloat16).astype(jnp.float32)   # kernel stores bf16

    assert out.shape == (B, num_classes)
    assert jnp.allclose(out, ref, atol=1e-2, rtol=1e-2), (
        f"max abs err = {jnp.max(jnp.abs(out - ref))}")
    print("KERNEL_OK")
</pallas_src>

<mosaic_0001>
module attributes {stable_mosaic.version = 11 : i64} {
  func.func @mlp_kernel(%arg0: i32, %arg1: memref<8x784xf32, #tpu.memory_space<vmem>>, %arg2: memref<784x128xbf16, #tpu.memory_space<vmem>>, %arg3: memref<1x128xf32, #tpu.memory_space<vmem>>, %arg4: memref<128x128xbf16, #tpu.memory_space<vmem>>, %arg5: memref<1x128xf32, #tpu.memory_space<vmem>>, %arg6: memref<8x128xbf16, #tpu.memory_space<vmem>>) attributes {dimension_semantics = [#tpu.dimension_semantics<parallel>], iteration_bounds = array<i64: 1>, scalar_prefetch = 0 : i64, scratch_operands = 0 : i64, tpu.core_type = #tpu.core_type<tc>, window_params = [{transform_indices = @transform_0, window_bounds = array<i64: 8, 784>}, {pipeline_mode = #tpu.pipeline_mode<synchronous>, transform_indices = @transform_1, window_bounds = array<i64: 784, 128>}, {pipeline_mode = #tpu.pipeline_mode<synchronous>, transform_indices = @transform_2, window_bounds = array<i64: 1, 128>}, {pipeline_mode = #tpu.pipeline_mode<synchronous>, transform_indices = @transform_3, window_bounds = array<i64: 128, 128>}, {pipeline_mode = #tpu.pipeline_mode<synchronous>, transform_indices = @transform_4, window_bounds = array<i64: 1, 128>}, {transform_indices = @transform_5, window_bounds = array<i64: 8, 128>}]} {
    %c0 = arith.constant 0 : index
    %c0_0 = arith.constant 0 : index
    %0 = vector.load %arg1[%c0, %c0_0] : memref<8x784xf32, #tpu.memory_space<vmem>>, vector<8x784xf32>
    %1 = arith.truncf %0 : vector<8x784xf32> to vector<8x784xbf16>
    %c0_1 = arith.constant 0 : index
    %c0_2 = arith.constant 0 : index
    %2 = vector.load %arg2[%c0_1, %c0_2] : memref<784x128xbf16, #tpu.memory_space<vmem>>, vector<784x128xbf16>
    %cst = arith.constant dense<0.000000e+00> : vector<8x128xf32>
    %3 = tpu.matmul %1, %2, %cst {dimension_numbers = #tpu.dot_dimension_numbers<[1], [0], [0], [1], [0, 0, 1, 1], [], []>} : vector<8x784xbf16>, vector<784x128xbf16>, vector<8x128xf32> -> vector<8x128xf32>
    %c0_3 = arith.constant 0 : index
    %c0_4 = arith.constant 0 : index
    %4 = vector.load %arg3[%c0_3, %c0_4] : memref<1x128xf32, #tpu.memory_space<vmem>>, vector<1x128xf32>
    %5 = vector.broadcast %4 : vector<1x128xf32> to vector<8x128xf32>
    %6 = arith.addf %3, %5 : vector<8x128xf32>
    %cst_5 = arith.constant 0.000000e+00 : f32
    %7 = vector.broadcast %cst_5 : f32 to vector<8x128xf32>
    %8 = arith.maximumf %6, %7 : vector<8x128xf32>
    %9 = arith.truncf %8 : vector<8x128xf32> to vector<8x128xbf16>
    %c0_6 = arith.constant 0 : index
    %c0_7 = arith.constant 0 : index
    %10 = vector.load %arg4[%c0_6, %c0_7] : memref<128x128xbf16, #tpu.memory_space<vmem>>, vector<128x128xbf16>
    %cst_8 = arith.constant dense<0.000000e+00> : vector<8x128xf32>
    %11 = tpu.matmul %9, %10, %cst_8 {dimension_numbers = #tpu.dot_dimension_numbers<[1], [0], [0], [1], [0, 0, 1, 1], [], []>} : vector<8x128xbf16>, vector<128x128xbf16>, vector<8x128xf32> -> vector<8x128xf32>
    %c0_9 = arith.constant 0 : index
    %c0_10 = arith.constant 0 : index
    %12 = vector.load %arg5[%c0_9, %c0_10] : memref<1x128xf32, #tpu.memory_space<vmem>>, vector<1x128xf32>
    %13 = vector.broadcast %12 : vector<1x128xf32> to vector<8x128xf32>
    %14 = arith.addf %11, %13 : vector<8x128xf32>
    %15 = arith.truncf %14 : vector<8x128xf32> to vector<8x128xbf16>
    %c0_11 = arith.constant 0 : index
    %c0_12 = arith.constant 0 : index
    %16 = vector.load %arg6[%c0_11, %c0_12] : memref<8x128xbf16, #tpu.memory_space<vmem>>, vector<8x128xbf16>
    tpu.vector_store %arg6[%c0_11, %c0_12], %15 {strides = array<i32>} : memref<8x128xbf16, #tpu.memory_space<vmem>>, vector<8x128xbf16>,
    return
  }
  func.func @transform_0(%arg0: i32) -> (i32, i32) {
    %c0_i32 = arith.constant 0 : i32
    %c0_i32_0 = arith.constant 0 : i32
    return %arg0, %c0_i32 : i32, i32
  }
  func.func @transform_1(%arg0: i32) -> (i32, i32) {
    %c0_i32 = arith.constant 0 : i32
    %c0_i32_0 = arith.constant 0 : i32
    %c0_i32_1 = arith.constant 0 : i32
    return %c0_i32, %c0_i32_0 : i32, i32
  }
  func.func @transform_2(%arg0: i32) -> (i32, i32) {
    %c0_i32 = arith.constant 0 : i32
    %c0_i32_0 = arith.constant 0 : i32
    %c0_i32_1 = arith.constant 0 : i32
    return %c0_i32, %c0_i32_0 : i32, i32
  }
  func.func @transform_3(%arg0: i32) -> (i32, i32) {
    %c0_i32 = arith.constant 0 : i32
    %c0_i32_0 = arith.constant 0 : i32
    %c0_i32_1 = arith.constant 0 : i32
    return %c0_i32, %c0_i32_0 : i32, i32
  }
  func.func @transform_4(%arg0: i32) -> (i32, i32) {
    %c0_i32 = arith.constant 0 : i32
    %c0_i32_0 = arith.constant 0 : i32
    %c0_i32_1 = arith.constant 0 : i32
    return %c0_i32, %c0_i32_0 : i32, i32
  }
  func.func @transform_5(%arg0: i32) -> (i32, i32) {
    %c0_i32 = arith.constant 0 : i32
    %c0_i32_0 = arith.constant 0 : i32
    return %arg0, %c0_i32 : i32, i32
  }
}

</mosaic_0001>

<bundles_post_ra>
// kernel: tpu_custom_call.1
= control target key start
LH: loop header
LB: loop body
LE: loop exit
PB: predicated region body
PF: predicated region fallthrough
CT: control target
= control target key end

     0   :  { %10 = vsyncpa [#allocation3], 0  ;;  %s1125_s0 = inlined_call_operand.hbm [shape: f32[8,784], index: 0, kind: input, shape index: {}]   ;;  %s1126_s1 = inlined_call_operand.hbm [shape: bf16[784,128], index: 1, kind: input, shape index: {}]   ;;  %s1127_s2 = inlined_call_operand.vmem [shape: f32[1,128], index: 2, kind: input, shape index: {}]   ;;  %s1128_s3 = inlined_call_operand.hbm [shape: bf16[128,128], index: 3, kind: input, shape index: {}]   ;;  %s1129_s4 = inlined_call_operand.vmem [shape: f32[1,128], index: 4, kind: input, shape index: {}]   ;;  %s1130_s5 = inlined_call_operand.hbm [shape: bf16[8,128], index: 5, kind: output, shape index: {}]  }
   0x1   :  { %11 = vsyncpa [#allocation6], 0  ;;  %s28_s20 = sshll.u32 %s1126_s1, 4  ;;  %s29_s20 = int_to_ptr.hbm [resolvable:$true] %s28_s20 }
   0x2   :  { %12 = vsyncpa [#allocation4], 0  ;;  %s1071_s21 = smov [#allocation5]   ;;  %s18_s25 = sshll.u32 %s1125_s0, 4  ;;  %s19_s25 = int_to_ptr.hbm [resolvable:$true] %s18_s25 }
   0x3   :  { %s30_s22 = sshll.u32 %s1071_s21, 4  ;;  %s1072_s26 = smov 64   ;;  %s31_s22 = int_to_ptr.vmem [resolvable:$true] %s30_s22 }
   0x4   :  { %s1073_s27 = smov 4   ;;  %s1074_s28 = smov [#allocation2]  }
   0x5   :  { %36 = dma.hbm_to_vmem [thread:$0]  %s29_s20, 6272, %s31_s22, [#allocation6], %s1072_s26, %s1072_s26, %s1073_s27  }
   0x6   :  { %s20_s29 = sshll.u32 %s1074_s28, 4  ;;  %s43_s7 = sshll.u32 %s1128_s3, 4  ;;  %s21_s29 = int_to_ptr.vmem [resolvable:$true] %s20_s29  ;;  %s44_s7 = int_to_ptr.hbm [resolvable:$true] %s43_s7 }
   0x7   :  { %23 = dma.hbm_to_vmem [thread:$0]  %s19_s25, 896, %s21_s29, [#allocation3]  }
   0x8   :  { %s1075_s1 = smov [#allocation7]  }
   0x9   :  { %s45_s8 = sshll.u32 %s1075_s1, 4  ;;  %s46_s8 = int_to_ptr.vmem [resolvable:$true] %s45_s8 }
   0xa   :  { %51 = dma.hbm_to_vmem [thread:$0]  %s44_s7, 1024, %s46_s8, [#allocation6], %s1072_s26, %s1072_s26, %s1073_s27  }
   0xb   :  { %1065 = dma.done.wait [#allocation3], 896  }
   0xc   :  { %1066 = vsyncadd [#allocation3], 4294966400 }
   0xd   :  { %1067 = dma.done.wait [#allocation6], 7296  }
   0xe   :  { %1068 = vsyncadd [#allocation6], 4294960000  ;;  %v911_v0 = vld [vmem:[#allocation5 + $0x38] sm:$0xff]  ;;  %v910_v3 = vld [vmem:[#allocation5 + $0x30] sm:$0xff]  ;;  %vm477_vm0 = vcmask 130048   ;;  %s1076_s10 = smov [#allocation8]  }
   0xf   :  { %v919_v1 = vld [vmem:[#allocation5 + $0x78] sm:$0xff]  ;;  %481 = vmatpush.bf16.msra.mxu0 %v911_v0  ;;  %v918_v4 = vld [vmem:[#allocation5 + $0x70] sm:$0xff]  ;;  %v909_v8 = vld [vmem:[#allocation5 + $0x28] sm:$0xff]  ;;  %s662_s11 = sshll.u32 %s1076_s10, 4  ;;  %s664_s14 = sshll.u32 %s1130_s5, 4  ;;  %s663_s11 = int_to_ptr.vmem [resolvable:$true] %s662_s11  ;;  %s665_s14 = int_to_ptr.hbm [resolvable:$true] %s664_s14 }
  0x10   :  { %v927_v2 = vld [vmem:[#allocation5 + $0xb8] sm:$0xff]  ;;  %494 = vmatpush.bf16.msra.mxu1 %v919_v1  ;;  %v926_v5 = vld [vmem:[#allocation5 + $0xb0] sm:$0xff]  ;;  %v917_v9 = vld [vmem:[#allocation5 + $0x68] sm:$0xff] }
  0x11   :  { %507 = vmatpush.bf16.msra.mxu2 %v927_v2  ;;  %v935_v6 = vld [vmem:[#allocation5 + $0xf8] sm:$0xff]  ;;  %v934_v7 = vld [vmem:[#allocation5 + $0xf0] sm:$0xff]  ;;  %v925_v10 = vld [vmem:[#allocation5 + $0xa8] sm:$0xff] }
  0x12   :  { %520 = vmatpush.bf16.msra.mxu3 %v935_v6  ;;  %v933_v11 = vld [vmem:[#allocation5 + $0xe8] sm:$0xff]  ;;  %v908_v12 = vld [vmem:[#allocation5 + $0x20] sm:$0xff]  ;;  %v907_v16 = vld [vmem:[#allocation5 + $0x18] sm:$0xff] }
  0x13   :  { %482 = vmatpush.bf16.msra.mxu0 %v910_v3  ;;  %v916_v13 = vld [vmem:[#allocation5 + $0x60] sm:$0xff]  ;;  %v915_v17 = vld [vmem:[#allocation5 + $0x58] sm:$0xff]  ;;  %v906_v20 = vld [vmem:[#allocation5 + $0x10] sm:$0xff] }
  0x14   :  { %495 = vmatpush.bf16.msra.mxu1 %v918_v4  ;;  %v924_v14 = vld [vmem:[#allocation5 + $0xa0] sm:$0xff]  ;;  %v923_v18 = vld [vmem:[#allocation5 + $0x98] sm:$0xff]  ;;  %v914_v21 = vld [vmem:[#allocation5 + $0x50] sm:$0xff] }
  0x15   :  { %508 = vmatpush.bf16.msra.mxu2 %v926_v5  ;;  %v932_v15 = vld [vmem:[#allocation5 + $0xe0] sm:$0xff]  ;;  %v931_v19 = vld [vmem:[#allocation5 + $0xd8] sm:$0xff]  ;;  %v922_v22 = vld [vmem:[#allocation5 + $0x90] sm:$0xff] }
  0x16   :  { %521 = vmatpush.bf16.msra.mxu3 %v934_v7  ;;  %v930_v23 = vld [vmem:[#allocation5 + $0xd0] sm:$0xff]  ;;  %v905_v24 = vld [vmem:[#allocation5 + $0x8] sm:$0xff]  ;;  %v904_v27 = vld [vmem:[#allocation5] sm:$0xff] }
  0x17   :  { %483 = vmatpush.bf16.msra.mxu0 %v909_v8  ;;  %v913_v25 = vld [vmem:[#allocation5 + $0x48] sm:$0xff]  ;;  %v912_v29 = vld [vmem:[#allocation5 + $0x40] sm:$0xff]  ;;  %v68_v31 = vld [vmem:[#allocation2 + $0x8] sm:$0xff] }
  0x18   :  { %496 = vmatpush.bf16.msra.mxu1 %v917_v9  ;;  %v921_v26 = vld [vmem:[#allocation5 + $0x88] sm:$0xff]  ;;  %v943_v32 = vld [vmem:[#allocation5 + $0x138] sm:$0xff]  ;;  %v920_v34 = vld [vmem:[#allocation5 + $0x80] sm:$0xff]  ;;  %v75_v37 = vpack.c.bf16 %v68_v31, %v68_v31 }
  0x19   :  { %509 = vmatpush.bf16.msra.mxu2 %v925_v10  ;;  %v929_v28 = vld [vmem:[#allocation5 + $0xc8] sm:$0xff]  ;;  %v951_v33 = vld [vmem:[#allocation5 + $0x178] sm:$0xff]  ;;  %v928_v38 = vld [vmem:[#allocation5 + $0xc0] sm:$0xff] }
  0x1a   :  { %522 = vmatpush.bf16.msra.mxu3 %v933_v11  ;;  %v67_v30 = vld [vmem:[#allocation2] sm:$0xff]  ;;  %v69_v35 = vld [vmem:[#allocation2 + $0x10] sm:$0xff]  ;;  %v952_v39 = vld [vmem:[#allocation5 + $0x180] sm:$0xff] }
  0x1b   :  { %484 = vmatpush.bf16.msra.mxu0 %v908_v12  ;;  %v74_v36 = vpack.c.bf16 %v67_v30, %v67_v30  ;;  %v70_v40 = vld [vmem:[#allocation2 + $0x18] sm:$0xff]  ;;  %v942_v41 = vld [vmem:[#allocation5 + $0x130] sm:$0xff]  ;;  %v76_v43 = vpack.c.bf16 %v69_v35, %v69_v35  ;;  %v941_v45 = vld [vmem:[#allocation5 + $0x128] sm:$0xff] }
  0x1c   :  { %497 = vmatpush.bf16.msra.mxu1 %v916_v13  ;;  %v950_v42 = vld [vmem:[#allocation5 + $0x170] sm:$0xff]  ;;  %v77_v44 = vpack.c.bf16 %v70_v40, %v70_v40  ;;  %v949_v46 = vld [vmem:[#allocation5 + $0x168] sm:$0xff]  ;;  %v940_v47 = vld [vmem:[#allocation5 + $0x120] sm:$0xff] }
  0x1d   :  { %510 = vmatpush.bf16.msra.mxu2 %v924_v14  ;;  %v948_v48 = vld [vmem:[#allocation5 + $0x160] sm:$0xff]  ;;  %v939_v49 = vld [vmem:[#allocation5 + $0x118] sm:$0xff]  ;;  %v938_v52 = vld [vmem:[#allocation5 + $0x110] sm:$0xff] }
  0x1e   :  { %523 = vmatpush.bf16.msra.mxu3 %v932_v15  ;;  %v947_v50 = vld [vmem:[#allocation5 + $0x158] sm:$0xff]  ;;  %v946_v53 = vld [vmem:[#allocation5 + $0x150] sm:$0xff]  ;;  %v937_v55 = vld [vmem:[#allocation5 + $0x108] sm:$0xff] }
  0x1f   :  { %485 = vmatpush.bf16.msra.mxu0 %v907_v16  ;;  %v73_v51 = vld [vmem:[#allocation2 + $0x30] sm:$0xff]  ;;  %v945_v56 = vld [vmem:[#allocation5 + $0x148] sm:$0xff]  ;;  %v936_v57 = vld [vmem:[#allocation5 + $0x100] sm:$0xff] }
  0x20   :  { %498 = vmatpush.bf16.msra.mxu1 %v915_v17  ;;  %v80_v54 = vpack.c.bf16 %v73_v51, %v73_v51  ;;  %v944_v58 = vld [vmem:[#allocation5 + $0x140] sm:$0xff]  ;;  %v71_v59 = vld [vmem:[#allocation2 + $0x20] sm:$0xff]  ;;  %v72_v60 = vld [vmem:[#allocation2 + $0x28] sm:$0xff] }
  0x21   :  { %511 = vmatpush.bf16.msra.mxu2 %v923_v18  ;;  %v78_v61 = vpack.c.bf16 %v71_v59, %v71_v59  ;;  %v79_v62 = vpack.c.bf16 %v72_v60, %v72_v60  ;;  %v960_v63 = vld [vmem:[#allocation7 + $0x38] sm:$0xff]  ;;  %v959_v0 = vld [vmem:[#allocation7 + $0x30] sm:$0xff]  ;;  %v958_v1 = vld [vmem:[#allocation7 + $0x28] sm:$0xff] }
  0x22   :  { %524 = vmatpush.bf16.msra.mxu3 %v931_v19  ;;  %v957_v2 = vld [vmem:[#allocation7 + $0x20] sm:$0xff]  ;;  %v956_v3 = vld [vmem:[#allocation7 + $0x18] sm:$0xff]  ;;  %v955_v4 = vld [vmem:[#allocation7 + $0x10] sm:$0xff] }
  0x23   :  { %486 = vmatpush.bf16.msra.mxu0 %v906_v20  ;;  %v954_v5 = vld [vmem:[#allocation7 + $0x8] sm:$0xff]  ;;  %v953_v8 = vld [vmem:[#allocation7] sm:$0xff] }
  0x24   :  { %499 = vmatpush.bf16.msra.mxu1 %v914_v21  ;;  %v967_v13 = vld [vmem:[%s1127_s2] ss:$0 sm:$0xff] }
  0x25   :  { %512 = vmatpush.bf16.msra.mxu2 %v922_v22  ;;  %v968_v31 = vld [vmem:[%s1129_s4] ss:$0 sm:$0xff] }
  0x26   :  { %525 = vmatpush.bf16.msra.mxu3 %v930_v23 }
  0x27   :  { %487 = vmatpush.bf16.msra.mxu0 %v905_v24 }
  0x28   :  { %500 = vmatpush.bf16.msra.mxu1 %v913_v25 }
  0x29   :  { %513 = vmatpush.bf16.msra.mxu2 %v921_v26 }
  0x2a   :  { %526 = vmatpush.bf16.msra.mxu3 %v929_v28 }
  0x2b   :  { %488 = vmatpush.bf16.msra.mxu0 %v904_v27 }
  0x2c   :  { %501 = vmatpush.bf16.msra.mxu1 %v912_v29 }
  0x2d   :  { %514 = vmatpush.bf16.msra.mxu2 %v920_v34 }
  0x2e   :  { %489 = vmatmul.bf16.vlgmr.msra.gmra.mxu0 %v74_v36  ;;  %527 = vmatpush.bf16.msra.mxu3 %v928_v38 }
  0x2f   :  { %533 = vmatpush.bf16.msrb.mxu0 %v943_v32  ;;  %502 = vmatmul.bf16.vlgmr.msra.gmra.mxu1 %v75_v37 }
  0x30   :  { %546 = vmatpush.bf16.msrb.mxu1 %v951_v33  ;;  %515 = vmatmul.bf16.vlgmr.msra.gmra.mxu2 %v76_v43 }
  0x31   :  { %566 = vmatpush.bf16.msrb.mxu2 %v952_v39  ;;  %528 = vmatmul.bf16.vlgmr.msra.gmra.mxu3 %v77_v44 }
  0x32   :  { %642 = vmatpush.bf16.msrb.mxu3 %v960_v63 }
  0x33   :  { %534 = vmatpush.bf16.msrb.mxu0 %v942_v41 }
  0x34   :  { %547 = vmatpush.bf16.msrb.mxu1 %v950_v42 }
  0x36   :  { %643 = vmatpush.bf16.msrb.mxu3 %v959_v0 }
  0x37   :  { %535 = vmatpush.bf16.msrb.mxu0 %v941_v45 }
  0x38   :  { %548 = vmatpush.bf16.msrb.mxu1 %v949_v46 }
  0x3a   :  { %644 = vmatpush.bf16.msrb.mxu3 %v958_v1 }
  0x3b   :  { %536 = vmatpush.bf16.msrb.mxu0 %v940_v47 }
  0x3c   :  { %549 = vmatpush.bf16.msrb.mxu1 %v948_v48 }
  0x3e   :  { %645 = vmatpush.bf16.msrb.mxu3 %v957_v2 }
  0x3f   :  { %537 = vmatpush.bf16.msrb.mxu0 %v939_v49 }
  0x40   :  { %550 = vmatpush.bf16.msrb.mxu1 %v947_v50  ;;  %871 = vmatmul.msk.bf16.vlgmr.msrb.gmra.mxu2 %vm477_vm0, %v80_v54 }
  0x42   :  { %646 = vmatpush.bf16.msrb.mxu3 %v956_v3 }
  0x43   :  { %538 = vmatpush.bf16.msrb.mxu0 %v938_v52 }
  0x44   :  { %551 = vmatpush.bf16.msrb.mxu1 %v946_v53 }
  0x46   :  { %647 = vmatpush.bf16.msrb.mxu3 %v955_v4 }
  0x47   :  { %539 = vmatpush.bf16.msrb.mxu0 %v937_v55 }
  0x48   :  { %552 = vmatpush.bf16.msrb.mxu1 %v945_v56 }
  0x4a   :  { %648 = vmatpush.bf16.msrb.mxu3 %v954_v5 }
  0x4b   :  { %540 = vmatpush.bf16.msrb.mxu0 %v936_v57 }
  0x4c   :  { %553 = vmatpush.bf16.msrb.mxu1 %v944_v58 }
  0x4e   :  { %541 = vmatmul.bf16.vlgmr.msrb.gmra.mxu0 %v78_v61  ;;  %649 = vmatpush.bf16.msrb.mxu3 %v953_v8 }
  0x4f   :  { %554 = vmatmul.bf16.vlgmr.msrb.gmra.mxu1 %v79_v62 }
  0xab   :  { %v490_v6 = vpop.f32.mrf.mxu0 }
  0xac   :  { %v503_v7 = vpop.f32.mrf.mxu1  ;;  %v491_v14 = vadd.f32 %v967_v13, %v490_v6 }
  0xae   :  { %v504_v17 = vadd.f32 %v503_v7, %v491_v14 }
  0xb3   :  { %v492_v9 = vpop.f32.mrf.mxu0  ;;  %v516_v11 = vpop.f32.mrf.mxu2 }
  0xb4   :  { %v505_v10 = vpop.f32.mrf.mxu1  ;;  %v529_v12 = vpop.f32.mrf.mxu3  ;;  %v517_v18 = vadd.f32 %v516_v11, %v504_v17 }
  0xb6   :  { %v530_v20 = vadd.f32 %v529_v12, %v517_v18 }
  0xbb   :  { %v518_v15 = vpop.f32.mrf.mxu2 }
  0xbc   :  { %v531_v16 = vpop.f32.mrf.mxu3 }
  0xc3   :  { %v568_v19 = vpop.f32.mrf.mxu2 }
  0xcb   :  { %v542_v21 = vpop.f32.mrf.mxu0  ;;  %v570_v25 = vpop.f32.mrf.mxu2 }
  0xcc   :  { %v555_v22 = vpop.f32.mrf.mxu1  ;;  %v543_v23 = vadd.f32 %v542_v21, %v530_v20 }
  0xce   :  { %v556_v24 = vadd.f32 %v555_v22, %v543_v23 }
  0xd0   :  { %v569_v26 = vadd.f32 %v568_v19, %v556_v24 }
  0xd2   :  { %v572_v27 = vmax.f32 %v569_v26, 0.0 }
  0xd3   :  { %v544_v28 = vpop.f32.mrf.mxu0 }
  0xd4   :  { %v557_v29 = vpop.f32.mrf.mxu1  ;;  %v573_v30 = vpack.c.bf16 %v572_v27, %v572_v27 }
  0xd6   :  { %650 = vmatmul.bf16.vlgmr.msrb.gmra.mxu3 %v573_v30 }
 0x159   :  { %v651_v32 = vpop.f32.mrf.mxu3 }
 0x15a   :  { %v652_v33 = vadd.f32 %v968_v31, %v651_v32 }
 0x15c   :  { %v655_v34 = vpack.c.bf16 %v652_v33, %v652_v33 }
 0x15e   :  { %656 = vst [vmem:[#allocation8] sm:$0xf] %v655_v34 }
 0x15f   :  { %667 = dma.vmem_to_hbm [thread:$0]  %s663_s11, 64, %s665_s14, [#allocation4]  }
 0x161   :  { %v653_v35 = vpop.f32.mrf.mxu3 }
 0x162   :  { %1069 = dma.done.wait [#allocation4], 64  }
 0x163   :  { %1070 = vsyncadd [#allocation4], 4294967232 }
 0x164   :  { %672 = vsyncpa [#allocation3], 1 }
 0x165   :  { %673 = vsyncpa [#allocation6], 1 }
 0x166   :  { %674 = vsyncpa [#allocation4], 1 }

</bundles_post_ra>
